<compile_context>
chip_gen: v5e
topology: v5e:2x2
jax: 0.10.0
libtpu: 0.0.40
codegen_flags: <defaults>
</compile_context>

<pallas_src>
import jax
import jax.numpy as jnp
from jax.experimental import pallas as pl
from jax.experimental.pallas import tpu as pltpu

_LANE = 128
_INV_SCALE = 1.0 / 127.5  # constant reciprocal: one vmul instead of a divide


def _lambda_kernel(x_ref, o_ref):
    # Elementwise hot path: x * (1/127.5) - 1.0, compute in f32, cast to out dtype.
    x = x_ref[...].astype(jnp.float32)
    o_ref[...] = (x * jnp.float32(_INV_SCALE) - jnp.float32(1.0)).astype(o_ref.dtype)


def _sublane_multiple(dtype) -> int:
    # Sub-32-bit dtypes pack along sublanes: 8 for 4B, 16 for 2B, 32 for 1B.
    return max(8, 32 // jnp.dtype(dtype).itemsize)


def _choose_lanes(n: int) -> int:
    """Widest lane width (multiple of 128) that exactly divides n (n % 128 == 0)."""
    for lanes in (4096, 2048, 1024, 512, 256, _LANE):
        if n % lanes == 0:
            return lanes
    return _LANE


def lambda_layer(x: jax.Array, *, target_block_bytes: int = 16 * 1024 * 1024) -> jax.Array:
    """Computes x / 127.5 - 1.0 with a Pallas TPU kernel (pure elementwise)."""
    orig_shape = x.shape
    # PyTorch promotes integer inputs to float; mirror that.
    out_dtype = x.dtype if jnp.issubdtype(x.dtype, jnp.floating) else jnp.float32

    n = x.size
    if n == 0:
        return jnp.zeros(orig_shape, out_dtype)

    flat = jnp.ravel(x)
    n_main = (n // _LANE) * _LANE

    # <128-element tail handled by a trivial XLA epilogue (no pad/slice HBM passes).
    tail_out = None
    if n_main < n:
        tail_out = (flat[n_main:].astype(jnp.float32) * _INV_SCALE - 1.0).astype(out_dtype)
    if n_main == 0:
        return tail_out.reshape(orig_shape)

    main = flat[:n_main] if n_main < n else flat
    lanes = _choose_lanes(n_main)
    rows = n_main // lanes
    x2d = main.reshape(rows, lanes)

    in_item = jnp.dtype(x.dtype).itemsize
    out_item = jnp.dtype(out_dtype).itemsize
    total_bytes = n_main * (in_item + out_item)

    # Step count: enough steps for pipelining (and to feed both v7x TCs), but
    # don't shred tiny tensors into overhead-dominated steps.
    steps_from_bytes = pl.cdiv(total_bytes, target_block_bytes)
    if total_bytes >= (8 << 20):
        min_steps = 8          # >=4 steps per TensorCore on 2-TC v7x
    elif total_bytes >= (1 << 20):
        min_steps = 4          # enough for load/compute/store overlap
    else:
        min_steps = 1          # tiny tensor: one step, no extra 0.35 us hits
    n_steps = max(steps_from_bytes, min_steps)

    sublane = max(_sublane_multiple(x.dtype), _sublane_multiple(out_dtype))
    tile_rows = (pl.cdiv(rows, n_steps) // sublane) * sublane
    tile_rows = max(sublane, tile_rows)
    tile_rows = min(tile_rows, rows)

    # Prefer a tile_rows that divides rows (avoids a masked ragged last block).
    if tile_rows < rows and rows % tile_rows != 0:
        lo = max(sublane, tile_rows - 32 * sublane)
        cand = tile_rows
        while cand >= lo:
            if rows % cand == 0:
                tile_rows = cand
                break
            cand -= sublane

    grid = (pl.cdiv(rows, tile_rows),)

    cost = pl.CostEstimate(
        flops=2 * n_main,
        transcendentals=0,
        bytes_accessed=total_bytes,
    )

    out2d = pl.pallas_call(
        _lambda_kernel,
        out_shape=jax.ShapeDtypeStruct((rows, lanes), out_dtype),
        grid_spec=pl.GridSpec(
            grid=grid,
            in_specs=[pl.BlockSpec((tile_rows, lanes), lambda i: (i, 0))],
            out_specs=pl.BlockSpec((tile_rows, lanes), lambda i: (i, 0)),
        ),
        compiler_params=pltpu.CompilerParams(
            dimension_semantics=("parallel",),
            # Raised above the default scoped limit so ~8 MiB double-buffered
            # in+out blocks fit on v7x (64 MiB physical) and v5e/v6e (128 MiB).
            vmem_limit_bytes=48 * 1024 * 1024,
        ),
        cost_estimate=cost,
    )(x2d)

    out_flat = out2d.reshape(-1)
    if tail_out is not None:
        out_flat = jnp.concatenate([out_flat, tail_out])
    return out_flat.reshape(orig_shape)


if __name__ == "__main__":
    key = jax.random.PRNGKey(0)
    # Small NCHW input consistent with an image-normalization LambdaLayer.
    x = jax.random.uniform(key, (2, 4, 16, 16), dtype=jnp.float32,
                           minval=0.0, maxval=255.0)
    y = lambda_layer(x)
    jax.block_until_ready(y)
    y_ref = x / 127.5 - 1.0
    assert y.shape == x.shape
    assert y.dtype == y_ref.dtype
    assert jnp.max(jnp.abs(y - y_ref)) < 1e-5

    # uint8 image path (integer -> float promotion, 1-byte sublane rounding).
    xu8 = jax.random.randint(jax.random.PRNGKey(1), (2, 3, 16, 16),
                             0, 256, dtype=jnp.int32).astype(jnp.uint8)
    yu8 = lambda_layer(xu8)
    jax.block_until_ready(yu8)
    yu8_ref = xu8.astype(jnp.float32) / 127.5 - 1.0
    assert yu8.dtype == jnp.float32
    assert jnp.max(jnp.abs(yu8 - yu8_ref)) < 1e-5

    # Odd element count: 128-aligned prefix via the kernel + tiny XLA tail.
    xo = jax.random.uniform(jax.random.PRNGKey(2), (200,), dtype=jnp.float32,
                            minval=0.0, maxval=255.0)
    yo = lambda_layer(xo)
    jax.block_until_ready(yo)
    assert jnp.max(jnp.abs(yo - (xo / 127.5 - 1.0))) < 1e-5

    print("KERNEL_OK")
</pallas_src>

<mosaic_0001>
module attributes {stable_mosaic.version = 11 : i64} {
  func.func @_lambda_kernel(%arg0: i32, %arg1: memref<1x2048xf32, #tpu.memory_space<vmem>>, %arg2: memref<1x2048xf32, #tpu.memory_space<vmem>>) attributes {dimension_semantics = [#tpu.dimension_semantics<parallel>], iteration_bounds = array<i64: 1>, scalar_prefetch = 0 : i64, scratch_operands = 0 : i64, tpu.core_type = #tpu.core_type<tc>, window_params = [{transform_indices = @transform_0, window_bounds = array<i64: 1, 2048>}, {transform_indices = @transform_1, window_bounds = array<i64: 1, 2048>}]} {
    %c0 = arith.constant 0 : index
    %c0_0 = arith.constant 0 : index
    %0 = vector.load %arg1[%c0, %c0_0] : memref<1x2048xf32, #tpu.memory_space<vmem>>, vector<1x2048xf32>
    %cst = arith.constant 0.00784313772 : f32
    %1 = vector.broadcast %cst : f32 to vector<1x2048xf32>
    %2 = arith.mulf %0, %1 : vector<1x2048xf32>
    %cst_1 = arith.constant 1.000000e+00 : f32
    %3 = vector.broadcast %cst_1 : f32 to vector<1x2048xf32>
    %4 = arith.subf %2, %3 : vector<1x2048xf32>
    %c0_2 = arith.constant 0 : index
    %c0_3 = arith.constant 0 : index
    %5 = vector.load %arg2[%c0_2, %c0_3] : memref<1x2048xf32, #tpu.memory_space<vmem>>, vector<1x2048xf32>
    tpu.vector_store %arg2[%c0_2, %c0_3], %4 {strides = array<i32>} : memref<1x2048xf32, #tpu.memory_space<vmem>>, vector<1x2048xf32>,
    return
  }
  func.func @transform_0(%arg0: i32) -> (i32, i32) {
    %c0_i32 = arith.constant 0 : i32
    %c0_i32_0 = arith.constant 0 : i32
    return %arg0, %c0_i32 : i32, i32
  }
  func.func @transform_1(%arg0: i32) -> (i32, i32) {
    %c0_i32 = arith.constant 0 : i32
    %c0_i32_0 = arith.constant 0 : i32
    return %arg0, %c0_i32 : i32, i32
  }
}

</mosaic_0001>

<bundles_post_ra>
// kernel: tpu_custom_call.1
= control target key start
LH: loop header
LB: loop body
LE: loop exit
PB: predicated region body
PF: predicated region fallthrough
CT: control target
= control target key end

     0   :  { %6 = vsyncpa [#allocation3], 0  ;;  %s122_s0 = inlined_call_operand.hbm [shape: f32[1,2048], index: 0, kind: input, shape index: {}]   ;;  %s123_s1 = inlined_call_operand.hbm [shape: f32[1,2048], index: 1, kind: output, shape index: {}]  }
   0x1   :  { %7 = vsyncpa [#allocation4], 0  ;;  %s13_s8 = sshll.u32 %s122_s0, 4  ;;  %s104_s9 = smov [#allocation2]   ;;  %s14_s8 = int_to_ptr.hbm [resolvable:$true] %s13_s8 }
   0x2   :  { %s15_s10 = sshll.u32 %s104_s9, 4  ;;  %s16_s10 = int_to_ptr.vmem [resolvable:$true] %s15_s10 }
   0x3   :  { %18 = dma.hbm_to_vmem [thread:$0]  %s14_s8, 256, %s16_s10, [#allocation3]  }
   0x4   :  { %100 = dma.done.wait [#allocation3], 256  }
   0x5   :  { %101 = vsyncadd [#allocation3], 4294967040  ;;  %v23_v0 = vld [vmem:[#allocation2] sm:$0xff]  ;;  %v24_v1 = vld [vmem:[#allocation2 + $0x8] sm:$0xff]  ;;  %s105_s11 = smov [#allocation5]   ;;  %s38_s15 = sshll.u32 %s123_s1, 4  ;;  %s39_s15 = int_to_ptr.hbm [resolvable:$true] %s38_s15 }
   0x6   :  { %v25_v2 = vmul.f32 0.007843138, %v23_v0  ;;  %v26_v3 = vmul.f32 0.007843138, %v24_v1  ;;  %s36_s12 = sshll.u32 %s105_s11, 4  ;;  %s37_s12 = int_to_ptr.vmem [resolvable:$true] %s36_s12 }
   0x8   :  { %v48_v4 = vadd.f32 -1.0, %v25_v2  ;;  %v49_v5 = vadd.f32 -1.0, %v26_v3 }
   0xa   :  { %29 = vst [vmem:[#allocation5] sm:$0xff] %v48_v4 }
   0xb   :  { %30 = vst [vmem:[#allocation5 + $0x8] sm:$0xff] %v49_v5 }
   0xc   :  { %41 = dma.vmem_to_hbm [thread:$0]  %s37_s12, 256, %s39_s15, [#allocation4]  }
   0xd   :  { %102 = dma.done.wait [#allocation4], 256  }
   0xe   :  { %103 = vsyncadd [#allocation4], 4294967040 }
   0xf   :  { %46 = vsyncpa [#allocation3], 1 }
  0x10   :  { %47 = vsyncpa [#allocation4], 1 }

</bundles_post_ra>
